<compile_context>
chip_gen: v7x
topology: tpu7x:2x2x1
jax: 0.10.0
libtpu: 0.0.40
codegen_flags: <defaults>
</compile_context>

<pallas_src>
import jax
import jax.numpy as jnp
from jax import lax
from jax.experimental import pallas as pl
from jax.experimental.pallas import tpu as pltpu

# ---------------- configuration (small, consistent with the module) ----------
DIM       = 32          # model dim
DIM_HEAD  = 16          # per-head dim
HEADS     = 4
FF_MULT   = 4
B         = 2           # batch
N         = 8           # sequence length

ATTN_INNER = DIM_HEAD * HEADS      # 64
FF_INNER   = DIM * FF_MULT         # 128
SCALE      = DIM_HEAD ** -0.5
EPS        = 1e-5                  # F.layer_norm default eps

# fused kernel-weight column layout (width 512, every section 128-lane friendly)
QKV_OFF  = 2 * FF_INNER            # 256: start of [q | k | v | pad] tile
ROT_OFF  = QKV_OFF + 128           # 384: start of [q@R | k@R | pad] tile
PROJ_W   = ROT_OFF + 128           # 512


# ------------------------------- kernel --------------------------------------
def block_kernel(x_ref, wf_ref, rope_ref, wout_ref, o_ref):
    x = x_ref[...]                                          # (B*N, D)

    # ---- LayerNorm (learnable weight folded into wf, bias buffer = 0) ----
    mu  = jnp.mean(x, axis=-1, keepdims=True)
    var = jnp.mean((x - mu) ** 2, axis=-1, keepdims=True)
    xn  = (x - mu) * lax.rsqrt(var + EPS)                   # (B*N, D)

    # ---- ONE fused projection: ff_value | ff_gate | q|k|v | rot(q)|rot(k) ----
    proj = jnp.dot(xn, wf_ref[...], preferred_element_type=jnp.float32)  # (B*N, 512)

    ffx  = proj[:, 0:FF_INNER]                  # (B*N, 128)  SwiGLU value half
    gate = proj[:, FF_INNER:2 * FF_INNER]       # (B*N, 128)  SwiGLU gate half
    qkv  = proj[:, QKV_OFF:QKV_OFF + 128]       # (B*N, 128)  [q(64)|k(16)|v(16)|0]
    qkvr = proj[:, ROT_OFF:ROT_OFF + 128]       # (B*N, 128)  [rot q|rot k|0|0]

    # ---- rotary emb + q scaling as a single fma with prebuilt tables --------
    cos = rope_ref[:, 0:128]
    sin = rope_ref[:, 128:256]
    roped = qkv * cos + qkvr * sin              # (B*N, 128)

    q_all = roped[:, 0:ATTN_INNER]                                   # (B*N, 64), scaled
    k_all = roped[:, ATTN_INNER:ATTN_INNER + DIM_HEAD]               # (B*N, 16)
    v_all = roped[:, ATTN_INNER + DIM_HEAD:ATTN_INNER + 2 * DIM_HEAD]  # (B*N, 16)

    # ---- multi-query attention, heads stacked along sublanes ----------------
    # rows of q_st ordered (batch, head, n)
    q_st = jnp.concatenate(
        [q_all[b * N:(b + 1) * N, h * DIM_HEAD:(h + 1) * DIM_HEAD]
         for b in range(B) for h in range(HEADS)], axis=0)           # (B*H*N, Dh)

    sims = []
    for b in range(B):
        q_b = q_st[b * HEADS * N:(b + 1) * HEADS * N, :]             # (H*N, Dh)
        k_b = k_all[b * N:(b + 1) * N, :]                            # (N, Dh)
        sims.append(lax.dot_general(q_b, k_b, (((1,), (1,)), ((), ())),
                                    preferred_element_type=jnp.float32))  # (H*N, N)
    sim = jnp.concatenate(sims, axis=0)                              # (B*H*N, N)

    # TODO(synk): optional attn_mask path (masked_fill with -finfo.max) not wired in.
    sim  = sim - jnp.max(sim, axis=-1, keepdims=True)
    e    = jnp.exp(sim)
    attn = e * pl.reciprocal(jnp.sum(e, axis=-1, keepdims=True), approx=True)

    outs = []
    for b in range(B):
        a_b = attn[b * HEADS * N:(b + 1) * HEADS * N, :]             # (H*N, N)
        v_b = v_all[b * N:(b + 1) * N, :]                            # (N, Dh)
        o_st = jnp.dot(a_b, v_b, preferred_element_type=jnp.float32)  # (H*N, Dh)
        # unstack heads back to (N, H*Dh) lane layout
        outs.append(jnp.concatenate(
            [o_st[h * N:(h + 1) * N, :] for h in range(HEADS)], axis=1))  # (N, 64)
    out_flat = jnp.concatenate(outs, axis=0)                         # (B*N, 64)

    # ---- output projections (two GEMMs so the ff GEMM can overlap softmax) --
    wffo = wout_ref[0:FF_INNER, :]                                   # (128, D)
    wao  = wout_ref[FF_INNER:FF_INNER + ATTN_INNER, :]               # (64, D)

    swiglu      = (gate * jax.nn.sigmoid(gate)) * ffx                # (B*N, 128)
    ff_branch   = jnp.dot(swiglu,   wffo, preferred_element_type=jnp.float32)
    attn_branch = jnp.dot(out_flat, wao,  preferred_element_type=jnp.float32)

    # ---- single store ----
    o_ref[...] = (attn_branch + ff_branch).astype(o_ref.dtype)


# ------------------------------ wrapper --------------------------------------
def parallel_transformer_block(x, params):
    b, n, d = x.shape
    x2 = x.reshape(b * n, d)                        # free reshape (row-major)
    out2 = pl.pallas_call(
        block_kernel,
        out_shape=jax.ShapeDtypeStruct((b * n, d), x.dtype),
        grid_spec=pltpu.PrefetchScalarGridSpec(
            num_scalar_prefetch=0,
            grid=(1,),                              # single step: no per-step overhead x2
            in_specs=[
                pl.BlockSpec((b * n, d),          lambda i: (0, 0)),  # x (flattened)
                pl.BlockSpec((d, PROJ_W),         lambda i: (0, 0)),  # fused weight
                pl.BlockSpec((b * n, 256),        lambda i: (0, 0)),  # cos|sin table
                pl.BlockSpec((FF_INNER + ATTN_INNER, d), lambda i: (0, 0)),  # ff_out|attn_out
            ],
            out_specs=pl.BlockSpec((b * n, d), lambda i: (0, 0)),
        ),
    )(x2, params["w_fused_k"], params["rope_tab"], params["w_out"])
    return out2.reshape(b, n, d)


# --------------------------- parameter setup ---------------------------------
def make_params(key):
    k0, k1, k2, k3 = jax.random.split(key, 4)
    sum_dims = ATTN_INNER + DIM_HEAD + DIM_HEAD + 2 * FF_INNER       # 352
    # stored in (in_features, out_features) layout (y = x @ W)
    w_fused    = jax.random.normal(k0, (DIM, sum_dims), jnp.float32) * 0.05
    w_attn_out = jax.random.normal(k1, (ATTN_INNER, DIM), jnp.float32) * 0.05
    w_ff_out   = jax.random.normal(k2, (FF_INNER, DIM), jnp.float32) * 0.05
    ln_w = 1.0 + 0.1 * jax.random.normal(k3, (DIM,), jnp.float32)    # non-trivial LN weight

    # module split order: [q(64) | k(16) | v(16) | ff(2*128)]
    wq   = w_fused[:, :ATTN_INNER]
    wk   = w_fused[:, ATTN_INNER:ATTN_INNER + DIM_HEAD]
    wv   = w_fused[:, ATTN_INNER + DIM_HEAD:ATTN_INNER + 2 * DIM_HEAD]
    wffv = w_fused[:, ATTN_INNER + 2 * DIM_HEAD:ATTN_INNER + 2 * DIM_HEAD + FF_INNER]
    wffg = w_fused[:, ATTN_INNER + 2 * DIM_HEAD + FF_INNER:]

    # rotate_half as a right-multiply signed-permutation matrix
    half = DIM_HEAD // 2
    R = jnp.zeros((DIM_HEAD, DIM_HEAD), jnp.float32)
    R = R.at[jnp.arange(half) + half, jnp.arange(half)].set(-1.0)
    R = R.at[jnp.arange(half), jnp.arange(half) + half].set(1.0)
    Rq = jnp.kron(jnp.eye(HEADS, dtype=jnp.float32), R)              # block-diag over heads

    # fused kernel weight: [ffv|ffg|q|k|v|0(32)|qR|kR|0(48)], LN weight folded in
    zeros32 = jnp.zeros((DIM, 2 * DIM_HEAD), jnp.float32)
    zeros48 = jnp.zeros((DIM, 48), jnp.float32)
    w_fused_k = jnp.concatenate(
        [wffv, wffg, wq, wk, wv, zeros32, wq @ Rq, wk @ R, zeros48], axis=1) * ln_w[:, None]
    assert w_fused_k.shape == (DIM, PROJ_W)

    # rotary tables (cos|sin), SCALE folded into q lanes, identity lanes for v
    inv_freq = 1.0 / (10000.0 ** (jnp.arange(0, DIM_HEAD, 2, dtype=jnp.float32) / DIM_HEAD))
    seq   = jnp.arange(N, dtype=jnp.float32)
    freqs = jnp.einsum("i,j->ij", seq, inv_freq)
    pos   = jnp.concatenate([freqs, freqs], axis=-1)                 # (N, Dh)
    cos_pos, sin_pos = jnp.cos(pos), jnp.sin(pos)

    cos_row = jnp.concatenate(
        [jnp.tile(cos_pos, (1, HEADS)) * SCALE,                      # q lanes (scaled)
         cos_pos,                                                    # k lanes
         jnp.ones((N, DIM_HEAD), jnp.float32),                       # v lanes (pass-through)
         jnp.zeros((N, 2 * DIM_HEAD), jnp.float32)], axis=1)         # pad
    sin_row = jnp.concatenate(
        [jnp.tile(sin_pos, (1, HEADS)) * SCALE,
         sin_pos,
         jnp.zeros((N, 3 * DIM_HEAD), jnp.float32)], axis=1)
    rope_tab = jnp.tile(jnp.concatenate([cos_row, sin_row], axis=1), (B, 1))  # (B*N, 256)

    w_out = jnp.concatenate([w_ff_out, w_attn_out], axis=0)          # (192, D)

    params = dict(w_fused_k=w_fused_k, rope_tab=rope_tab, w_out=w_out)
    ref_mats = dict(w_fused=w_fused, w_attn_out=w_attn_out, w_ff_out=w_ff_out,
                    ln_w=ln_w, cos=cos_pos, sin=sin_pos)
    return params, ref_mats


# ------------------------- pure-JAX reference --------------------------------
def ref_forward(x, m):
    mu  = x.mean(-1, keepdims=True)
    var = ((x - mu) ** 2).mean(-1, keepdims=True)
    xn  = (x - mu) / jnp.sqrt(var + EPS) * m["ln_w"]
    fused = xn @ m["w_fused"]
    q, k, v, ff = jnp.split(
        fused, [ATTN_INNER, ATTN_INNER + DIM_HEAD, ATTN_INNER + 2 * DIM_HEAD], axis=-1)
    q = q.reshape(B, N, HEADS, DIM_HEAD).transpose(0, 2, 1, 3)       # b h n d

    def rot_half(t):
        t1, t2 = jnp.split(t, 2, axis=-1)
        return jnp.concatenate([-t2, t1], axis=-1)

    def rope(t):
        return t * m["cos"] + rot_half(t) * m["sin"]

    q = rope(q) * SCALE
    k = rope(k)
    sim = jnp.einsum("bhid,bjd->bhij", q, k)
    sim = sim - sim.max(-1, keepdims=True)
    attn = jax.nn.softmax(sim, axis=-1)
    out = jnp.einsum("bhij,bjd->bhid", attn, v)
    out = out.transpose(0, 2, 1, 3).reshape(B, N, ATTN_INNER)
    ffx, gate = jnp.split(ff, 2, axis=-1)
    swiglu = jax.nn.silu(gate) * ffx
    return out @ m["w_attn_out"] + swiglu @ m["w_ff_out"]


# --------------------------------- main ---------------------------------------
if __name__ == "__main__":
    key = jax.random.PRNGKey(0)
    kp, kx = jax.random.split(key)
    params, ref_mats = make_params(kp)
    x = jax.random.normal(kx, (B, N, DIM), jnp.float32)

    out = parallel_transformer_block(x, params)
    out = jax.block_until_ready(out)

    ref = ref_forward(x, ref_mats)
    assert out.shape == (B, N, DIM)
    # tolerance relaxed to 2e-3 to cover pl.reciprocal(approx=True) in the softmax
    assert jnp.allclose(out, ref, rtol=2e-3, atol=2e-3), (
        f"max abs err = {jnp.max(jnp.abs(out - ref))}")
    print("KERNEL_OK")
</pallas_src>

<mosaic_0001>
module attributes {stable_mosaic.version = 11 : i64} {
  func.func @block_kernel(%arg0: i32, %arg1: memref<16x32xf32, #tpu.memory_space<vmem>>, %arg2: memref<32x512xf32, #tpu.memory_space<vmem>>, %arg3: memref<16x256xf32, #tpu.memory_space<vmem>>, %arg4: memref<192x32xf32, #tpu.memory_space<vmem>>, %arg5: memref<16x32xf32, #tpu.memory_space<vmem>>) attributes {dimension_semantics = [#tpu.dimension_semantics<arbitrary>], iteration_bounds = array<i64: 1>, scalar_prefetch = 0 : i64, scratch_operands = 0 : i64, tpu.core_type = #tpu.core_type<tc>, window_params = [{pipeline_mode = #tpu.pipeline_mode<synchronous>, transform_indices = @transform_0, window_bounds = array<i64: 16, 32>}, {pipeline_mode = #tpu.pipeline_mode<synchronous>, transform_indices = @transform_1, window_bounds = array<i64: 32, 512>}, {pipeline_mode = #tpu.pipeline_mode<synchronous>, transform_indices = @transform_2, window_bounds = array<i64: 16, 256>}, {pipeline_mode = #tpu.pipeline_mode<synchronous>, transform_indices = @transform_3, window_bounds = array<i64: 192, 32>}, {pipeline_mode = #tpu.pipeline_mode<synchronous>, transform_indices = @transform_4, window_bounds = array<i64: 16, 32>}]} {
    %c0 = arith.constant 0 : index
    %c0_0 = arith.constant 0 : index
    %0 = vector.load %arg1[%c0, %c0_0] : memref<16x32xf32, #tpu.memory_space<vmem>>, vector<16x32xf32>
    %cst = arith.constant dense<0.000000e+00> : vector<16xf32>
    %1 = vector.multi_reduction <add>, %0, %cst [1] : vector<16x32xf32> to vector<16xf32>
    %2 = vector.shape_cast %1 : vector<16xf32> to vector<16x1xf32>
    %cst_1 = arith.constant 3.200000e+01 : f32
    %3 = vector.broadcast %cst_1 : f32 to vector<16x1xf32>
    %4 = arith.divf %2, %3 : vector<16x1xf32>
    %5 = vector.broadcast %4 : vector<16x1xf32> to vector<16x32xf32>
    %6 = arith.subf %0, %5 : vector<16x32xf32>
    %7 = arith.mulf %6, %6 : vector<16x32xf32>
    %cst_2 = arith.constant dense<0.000000e+00> : vector<16xf32>
    %8 = vector.multi_reduction <add>, %7, %cst_2 [1] : vector<16x32xf32> to vector<16xf32>
    %9 = vector.shape_cast %8 : vector<16xf32> to vector<16x1xf32>
    %cst_3 = arith.constant 3.200000e+01 : f32
    %10 = vector.broadcast %cst_3 : f32 to vector<16x1xf32>
    %11 = arith.divf %9, %10 : vector<16x1xf32>
    %12 = vector.broadcast %4 : vector<16x1xf32> to vector<16x32xf32>
    %13 = arith.subf %0, %12 : vector<16x32xf32>
    %cst_4 = arith.constant 9.99999974E-6 : f32
    %14 = vector.broadcast %cst_4 : f32 to vector<16x1xf32>
    %15 = arith.addf %11, %14 : vector<16x1xf32>
    %16 = math.rsqrt %15 : vector<16x1xf32>
    %17 = vector.broadcast %16 : vector<16x1xf32> to vector<16x32xf32>
    %18 = arith.mulf %13, %17 : vector<16x32xf32>
    %c0_5 = arith.constant 0 : index
    %c0_6 = arith.constant 0 : index
    %19 = vector.load %arg2[%c0_5, %c0_6] : memref<32x512xf32, #tpu.memory_space<vmem>>, vector<32x512xf32>
    %cst_7 = arith.constant dense<0.000000e+00> : vector<16x512xf32>
    %20 = tpu.matmul %18, %19, %cst_7 {dimension_numbers = #tpu.dot_dimension_numbers<[1], [0], [0], [1], [0, 0, 1, 1], [], []>} : vector<16x32xf32>, vector<32x512xf32>, vector<16x512xf32> -> vector<16x512xf32>
    %21 = vector.extract_strided_slice %20 {offsets = [0, 0], sizes = [16, 128], strides = [1, 1]} : vector<16x512xf32> to vector<16x128xf32>
    %22 = vector.extract_strided_slice %20 {offsets = [0, 128], sizes = [16, 128], strides = [1, 1]} : vector<16x512xf32> to vector<16x128xf32>
    %23 = vector.extract_strided_slice %20 {offsets = [0, 256], sizes = [16, 128], strides = [1, 1]} : vector<16x512xf32> to vector<16x128xf32>
    %24 = vector.extract_strided_slice %20 {offsets = [0, 384], sizes = [16, 128], strides = [1, 1]} : vector<16x512xf32> to vector<16x128xf32>
    %c0_8 = arith.constant 0 : index
    %c0_9 = arith.constant 0 : index
    %25 = vector.load %arg3[%c0_8, %c0_9] : memref<16x256xf32, #tpu.memory_space<vmem>>, vector<16x128xf32>
    %c0_10 = arith.constant 0 : index
    %c128 = arith.constant 128 : index
    %26 = vector.load %arg3[%c0_10, %c128] : memref<16x256xf32, #tpu.memory_space<vmem>>, vector<16x128xf32>
    %27 = arith.mulf %23, %25 : vector<16x128xf32>
    %28 = arith.mulf %24, %26 : vector<16x128xf32>
    %29 = arith.addf %27, %28 : vector<16x128xf32>
    %30 = vector.extract_strided_slice %29 {offsets = [0, 0], sizes = [16, 64], strides = [1, 1]} : vector<16x128xf32> to vector<16x64xf32>
    %31 = vector.extract_strided_slice %29 {offsets = [0, 64], sizes = [16, 16], strides = [1, 1]} : vector<16x128xf32> to vector<16x16xf32>
    %32 = vector.extract_strided_slice %29 {offsets = [0, 80], sizes = [16, 16], strides = [1, 1]} : vector<16x128xf32> to vector<16x16xf32>
    %33 = vector.extract_strided_slice %30 {offsets = [0, 0], sizes = [8, 16], strides = [1, 1]} : vector<16x64xf32> to vector<8x16xf32>
    %34 = vector.extract_strided_slice %30 {offsets = [0, 16], sizes = [8, 16], strides = [1, 1]} : vector<16x64xf32> to vector<8x16xf32>
    %35 = vector.extract_strided_slice %30 {offsets = [0, 32], sizes = [8, 16], strides = [1, 1]} : vector<16x64xf32> to vector<8x16xf32>
    %36 = vector.extract_strided_slice %30 {offsets = [0, 48], sizes = [8, 16], strides = [1, 1]} : vector<16x64xf32> to vector<8x16xf32>
    %37 = vector.extract_strided_slice %30 {offsets = [8, 0], sizes = [8, 16], strides = [1, 1]} : vector<16x64xf32> to vector<8x16xf32>
    %38 = vector.extract_strided_slice %30 {offsets = [8, 16], sizes = [8, 16], strides = [1, 1]} : vector<16x64xf32> to vector<8x16xf32>
    %39 = vector.extract_strided_slice %30 {offsets = [8, 32], sizes = [8, 16], strides = [1, 1]} : vector<16x64xf32> to vector<8x16xf32>
    %40 = vector.extract_strided_slice %30 {offsets = [8, 48], sizes = [8, 16], strides = [1, 1]} : vector<16x64xf32> to vector<8x16xf32>
    %41 = tpu.concatenate %33, %34, %35, %36, %37, %38, %39, %40 in 0 : vector<8x16xf32>, vector<8x16xf32>, vector<8x16xf32>, vector<8x16xf32>, vector<8x16xf32>, vector<8x16xf32>, vector<8x16xf32>, vector<8x16xf32> -> vector<64x16xf32>
    %42 = vector.extract_strided_slice %41 {offsets = [0, 0], sizes = [32, 16], strides = [1, 1]} : vector<64x16xf32> to vector<32x16xf32>
    %43 = vector.extract_strided_slice %31 {offsets = [0, 0], sizes = [8, 16], strides = [1, 1]} : vector<16x16xf32> to vector<8x16xf32>
    %cst_11 = arith.constant dense<0.000000e+00> : vector<32x8xf32>
    %44 = tpu.matmul %42, %43, %cst_11 {dimension_numbers = #tpu.dot_dimension_numbers<[1], [1], [0], [0], [0, 0, 1, 0], [], []>} : vector<32x16xf32>, vector<8x16xf32>, vector<32x8xf32> -> vector<32x8xf32>
    %45 = vector.extract_strided_slice %41 {offsets = [32, 0], sizes = [32, 16], strides = [1, 1]} : vector<64x16xf32> to vector<32x16xf32>
    %46 = vector.extract_strided_slice %31 {offsets = [8, 0], sizes = [8, 16], strides = [1, 1]} : vector<16x16xf32> to vector<8x16xf32>
    %cst_12 = arith.constant dense<0.000000e+00> : vector<32x8xf32>
    %47 = tpu.matmul %45, %46, %cst_12 {dimension_numbers = #tpu.dot_dimension_numbers<[1], [1], [0], [0], [0, 0, 1, 0], [], []>} : vector<32x16xf32>, vector<8x16xf32>, vector<32x8xf32> -> vector<32x8xf32>
    %48 = tpu.concatenate %44, %47 in 0 : vector<32x8xf32>, vector<32x8xf32> -> vector<64x8xf32>
    %cst_13 = arith.constant dense<0xFF800000> : vector<64xf32>
    %49 = vector.multi_reduction <maximumf>, %48, %cst_13 [1] : vector<64x8xf32> to vector<64xf32>
    %50 = vector.shape_cast %49 : vector<64xf32> to vector<64x1xf32>
    %51 = vector.broadcast %50 : vector<64x1xf32> to vector<64x8xf32>
    %52 = arith.subf %48, %51 : vector<64x8xf32>
    %53 = math.exp %52 : vector<64x8xf32>
    %cst_14 = arith.constant dense<0.000000e+00> : vector<64xf32>
    %54 = vector.multi_reduction <add>, %53, %cst_14 [1] : vector<64x8xf32> to vector<64xf32>
    %55 = vector.shape_cast %54 : vector<64xf32> to vector<64x1xf32>
    %56 = tpu.reciprocal %55 {approx = true} : vector<64x1xf32> -> vector<64x1xf32>
    %57 = vector.broadcast %56 : vector<64x1xf32> to vector<64x8xf32>
    %58 = arith.mulf %53, %57 : vector<64x8xf32>
    %59 = vector.extract_strided_slice %58 {offsets = [0, 0], sizes = [32, 8], strides = [1, 1]} : vector<64x8xf32> to vector<32x8xf32>
    %60 = vector.extract_strided_slice %32 {offsets = [0, 0], sizes = [8, 16], strides = [1, 1]} : vector<16x16xf32> to vector<8x16xf32>
    %cst_15 = arith.constant dense<0.000000e+00> : vector<32x16xf32>
    %61 = tpu.matmul %59, %60, %cst_15 {dimension_numbers = #tpu.dot_dimension_numbers<[1], [0], [0], [1], [0, 0, 1, 1], [], []>} : vector<32x8xf32>, vector<8x16xf32>, vector<32x16xf32> -> vector<32x16xf32>
    %62 = vector.extract_strided_slice %61 {offsets = [0, 0], sizes = [8, 16], strides = [1, 1]} : vector<32x16xf32> to vector<8x16xf32>
    %63 = vector.extract_strided_slice %61 {offsets = [8, 0], sizes = [8, 16], strides = [1, 1]} : vector<32x16xf32> to vector<8x16xf32>
    %64 = vector.extract_strided_slice %61 {offsets = [16, 0], sizes = [8, 16], strides = [1, 1]} : vector<32x16xf32> to vector<8x16xf32>
    %65 = vector.extract_strided_slice %61 {offsets = [24, 0], sizes = [8, 16], strides = [1, 1]} : vector<32x16xf32> to vector<8x16xf32>
    %66 = tpu.concatenate %62, %63, %64, %65 in 1 : vector<8x16xf32>, vector<8x16xf32>, vector<8x16xf32>, vector<8x16xf32> -> vector<8x64xf32>
    %67 = vector.extract_strided_slice %58 {offsets = [32, 0], sizes = [32, 8], strides = [1, 1]} : vector<64x8xf32> to vector<32x8xf32>
    %68 = vector.extract_strided_slice %32 {offsets = [8, 0], sizes = [8, 16], strides = [1, 1]} : vector<16x16xf32> to vector<8x16xf32>
    %cst_16 = arith.constant dense<0.000000e+00> : vector<32x16xf32>
    %69 = tpu.matmul %67, %68, %cst_16 {dimension_numbers = #tpu.dot_dimension_numbers<[1], [0], [0], [1], [0, 0, 1, 1], [], []>} : vector<32x8xf32>, vector<8x16xf32>, vector<32x16xf32> -> vector<32x16xf32>
    %70 = vector.extract_strided_slice %69 {offsets = [0, 0], sizes = [8, 16], strides = [1, 1]} : vector<32x16xf32> to vector<8x16xf32>
    %71 = vector.extract_strided_slice %69 {offsets = [8, 0], sizes = [8, 16], strides = [1, 1]} : vector<32x16xf32> to vector<8x16xf32>
    %72 = vector.extract_strided_slice %69 {offsets = [16, 0], sizes = [8, 16], strides = [1, 1]} : vector<32x16xf32> to vector<8x16xf32>
    %73 = vector.extract_strided_slice %69 {offsets = [24, 0], sizes = [8, 16], strides = [1, 1]} : vector<32x16xf32> to vector<8x16xf32>
    %74 = tpu.concatenate %70, %71, %72, %73 in 1 : vector<8x16xf32>, vector<8x16xf32>, vector<8x16xf32>, vector<8x16xf32> -> vector<8x64xf32>
    %75 = tpu.concatenate %66, %74 in 0 : vector<8x64xf32>, vector<8x64xf32> -> vector<16x64xf32>
    %c0_17 = arith.constant 0 : index
    %c0_18 = arith.constant 0 : index
    %76 = vector.load %arg4[%c0_17, %c0_18] : memref<192x32xf32, #tpu.memory_space<vmem>>, vector<128x32xf32>
    %c128_19 = arith.constant 128 : index
    %c0_20 = arith.constant 0 : index
    %77 = vector.load %arg4[%c128_19, %c0_20] : memref<192x32xf32, #tpu.memory_space<vmem>>, vector<64x32xf32>
    %78 = arith.negf %22 : vector<16x128xf32>
    %79 = math.exp %78 : vector<16x128xf32>
    %cst_21 = arith.constant 1.000000e+00 : f32
    %80 = vector.broadcast %cst_21 : f32 to vector<16x128xf32>
    %81 = arith.addf %80, %79 : vector<16x128xf32>
    %82 = arith.divf %80, %81 : vector<16x128xf32>
    %83 = arith.mulf %22, %82 : vector<16x128xf32>
    %84 = arith.mulf %83, %21 : vector<16x128xf32>
    %cst_22 = arith.constant dense<0.000000e+00> : vector<16x32xf32>
    %85 = tpu.matmul %84, %76, %cst_22 {dimension_numbers = #tpu.dot_dimension_numbers<[1], [0], [0], [1], [0, 0, 1, 1], [], []>} : vector<16x128xf32>, vector<128x32xf32>, vector<16x32xf32> -> vector<16x32xf32>
    %cst_23 = arith.constant dense<0.000000e+00> : vector<16x32xf32>
    %86 = tpu.matmul %75, %77, %cst_23 {dimension_numbers = #tpu.dot_dimension_numbers<[1], [0], [0], [1], [0, 0, 1, 1], [], []>} : vector<16x64xf32>, vector<64x32xf32>, vector<16x32xf32> -> vector<16x32xf32>
    %87 = arith.addf %86, %85 : vector<16x32xf32>
    %c0_24 = arith.constant 0 : index
    %c0_25 = arith.constant 0 : index
    %88 = vector.load %arg5[%c0_24, %c0_25] : memref<16x32xf32, #tpu.memory_space<vmem>>, vector<16x32xf32>
    tpu.vector_store %arg5[%c0_24, %c0_25], %87 {strides = array<i32>} : memref<16x32xf32, #tpu.memory_space<vmem>>, vector<16x32xf32>,
    return
  }
  func.func @transform_0(%arg0: i32) -> (i32, i32) {
    %c0_i32 = arith.constant 0 : i32
    %c0_i32_0 = arith.constant 0 : i32
    %c0_i32_1 = arith.constant 0 : i32
    return %c0_i32, %c0_i32_0 : i32, i32
  }
  func.func @transform_1(%arg0: i32) -> (i32, i32) {
    %c0_i32 = arith.constant 0 : i32
    %c0_i32_0 = arith.constant 0 : i32
    %c0_i32_1 = arith.constant 0 : i32
    return %c0_i32, %c0_i32_0 : i32, i32
  }
  func.func @transform_2(%arg0: i32) -> (i32, i32) {
    %c0_i32 = arith.constant 0 : i32
    %c0_i32_0 = arith.constant 0 : i32
    %c0_i32_1 = arith.constant 0 : i32
    return %c0_i32, %c0_i32_0 : i32, i32
  }
  func.func @transform_3(%arg0: i32) -> (i32, i32) {
    %c0_i32 = arith.constant 0 : i32
    %c0_i32_0 = arith.constant 0 : i32
    %c0_i32_1 = arith.constant 0 : i32
    return %c0_i32, %c0_i32_0 : i32, i32
  }
  func.func @transform_4(%arg0: i32) -> (i32, i32) {
    %c0_i32 = arith.constant 0 : i32
    %c0_i32_0 = arith.constant 0 : i32
    %c0_i32_1 = arith.constant 0 : i32
    return %c0_i32, %c0_i32_0 : i32, i32
  }
}

</mosaic_0001>

<bundles_post_ra>
// kernel: tpu_custom_call.1
= control target key start
LH: loop header
LB: loop body
LE: loop exit
PB: predicated region body
PF: predicated region fallthrough
CT: control target
= control target key end

     0   :  { %vm20_vm0 = vcmask 261120   ;;  %s1557_s0 = inlined_call_operand.vmem [shape: f32[16,32], index: 0, kind: input, shape index: {}]   ;;  %s1558_s1 = inlined_call_operand.vmem [shape: f32[32,512], index: 1, kind: input, shape index: {}]   ;;  %s1559_s2 = inlined_call_operand.vmem [shape: f32[16,256], index: 2, kind: input, shape index: {}]   ;;  %s1560_s3 = inlined_call_operand.vmem [shape: f32[192,32], index: 3, kind: input, shape index: {}]   ;;  %s1561_s4 = inlined_call_operand.hbm [shape: f32[16,32], index: 4, kind: output, shape index: {}]  }
   0x1   :  { %v18_v0 = vld [vmem:[%s1557_s0] sm:$0xff]  ;;  %v19_v1 = vld [vmem:[%s1557_s0 + $0x8] sm:$0xff] }
   0x2   :  { %9 = vsyncpa [#allocation3], 0  ;;  %v21_v2 = vsel %vm20_vm0, %v18_v0, 0.0  ;;  %v24_v3 = vsel %vm20_vm0, %v19_v1, 0.0  ;;  %v49_v14 = vld [vmem:[%s1558_s1 + $0x8] sm:$0xff]  ;;  %v48_v17 = vld [vmem:[%s1558_s1] sm:$0xff] }
   0x3   :  { %22 = vadd.xlane.f32.xlu0 %v21_v2  ;;  %v53_v15 = vld [vmem:[%s1558_s1 + $0x28] sm:$0xff]  ;;  %v52_v18 = vld [vmem:[%s1558_s1 + $0x20] sm:$0xff]  ;;  %v1283_v25 = vmov 0.0   ;;  %v51_v27 = vld [vmem:[%s1558_s1 + $0x18] sm:$0xff]  ;;  %vm250_vm1 = vcmask 130048   ;;  %s1284_s30 = smov 112  }
   0x4   :  { %v1138_v16 = vpack.c.bf16 %v53_v15, %v49_v14  ;;  %v1140_v19 = vpack.c.bf16 %v52_v18, %v48_v17  ;;  %v57_v20 = vld [vmem:[%s1558_s1 + $0x48] sm:$0xff]  ;;  %v56_v22 = vld [vmem:[%s1558_s1 + $0x40] sm:$0xff]  ;;  %134 = vmatprep.mubr.f32.mxu0 %v1283_v25  ;;  %v55_v28 = vld [vmem:[%s1558_s1 + $0x38] sm:$0xff]  ;;  %s1285_s5 = smov 64   ;;  %s1287_s6 = smov 96   ;;  %vm443_vm2 = vcmask 64512  }
   0x5   :  { %v61_v21 = vld [vmem:[%s1558_s1 + $0x68] sm:$0xff]  ;;  %v60_v24 = vld [vmem:[%s1558_s1 + $0x60] sm:$0xff]  ;;  %v1146_v29 = vpack.c.bf16 %v55_v28, %v51_v27  ;;  %v50_v36 = vld [vmem:[%s1558_s1 + $0x10] sm:$0xff]  ;;  %s1288_s7 = smov 48   ;;  %s1289_s26 = smov 16   ;;  %vm646_vm3 = vcmask 392192  }
   0x6   :  { %1139 = vmatprep.subr.bf16.mxu0 %v1138_v16  ;;  %v1142_v23 = vpack.c.bf16 %v61_v21, %v57_v20  ;;  %v1144_v26 = vpack.c.bf16 %v60_v24, %v56_v22  ;;  %v54_v37 = vld [vmem:[%s1558_s1 + $0x30] sm:$0xff]  ;;  %v59_v38 = vld [vmem:[%s1558_s1 + $0x58] sm:$0xff]  ;;  %v224_v55 = vld [vmem:[%s1559_s2] sm:$0xff]  ;;  %s1290_s27 = smov 32   ;;  %vm878_vm4 = vcmask 523264  }
   0x7   :  { %25 = vadd.xlane.f32.xlu0 %v24_v3  ;;  %1141 = vmatpush1.bf16.msra.mxu0 %v1140_v19  ;;  %v63_v39 = vld [vmem:[%s1558_s1 + $0x78] sm:$0xff]  ;;  %v1148_v41 = vpack.c.bf16 %v54_v37, %v50_v36  ;;  %v58_v44 = vld [vmem:[%s1558_s1 + $0x50] sm:$0xff]  ;;  %v226_v56 = vld [vmem:[%s1559_s2 + $0x8] sm:$0xff] }
   0x8   :  { %1143 = vmatprep.subr.bf16.mxu0 %v1142_v23  ;;  %v1150_v43 = vpack.c.bf16 %v63_v39, %v59_v38  ;;  %v62_v45 = vld [vmem:[%s1558_s1 + $0x70] sm:$0xff]  ;;  %v227_v62 = vld [vmem:[%s1559_s2 + $0x18] sm:$0xff] }
   0x9   :  { %v1152_v47 = vpack.c.bf16 %v62_v45, %v58_v44  ;;  %v225_v61 = vld [vmem:[%s1559_s2 + $0x10] sm:$0xff]  ;;  %s1286_s2 = smov 80  }
   0xb   :  { %1145 = vmatpush1.bf16.msra.mxu0 %v1144_v26 }
   0xc   :  { %1147 = vmatprep.subr.bf16.mxu0 %v1146_v29 }
  0x90   :  { %v23_v4 = vpop.xlane.xlu0 %22 }
  0x91   :  { %v28_v5 = vmul.f32 0.03125, %v23_v4 }
  0x93   :  { %v30_v6 = vsub.f32 %v18_v0, %v28_v5 }
  0x94   :  { %v26_v7 = vpop.xlane.xlu0 %25 }
  0x95   :  { %v29_v8 = vmul.f32 0.03125, %v26_v7  ;;  %v32_v9 = vmul.f32 %v30_v6, %v30_v6 }
  0x97   :  { %v31_v10 = vsub.f32 %v19_v1, %v29_v8  ;;  %v34_v11 = vsel %vm20_vm0, %v32_v9, 0.0 }
  0x98   :  { %35 = vadd.xlane.f32.xlu1 %v34_v11 }
  0x99   :  { %v33_v12 = vmul.f32 %v31_v10, %v31_v10 }
  0x9b   :  { %v37_v13 = vsel %vm20_vm0, %v33_v12, 0.0 }
  0x9c   :  { %38 = vadd.xlane.f32.xlu1 %v37_v13 }
 0x125   :  { %v36_v30 = vpop.xlane.xlu1 %35 }
 0x126   :  { %v40_v31 = vmul.f32 0.03125, %v36_v30 }
 0x128   :  { %v42_v32 = vadd.f32 1e-05, %v40_v31 }
 0x129   :  { %v39_v33 = vpop.xlane.xlu1 %38 }
 0x12a   :  { %1215 = vrsqrt.f32 %v42_v32  ;;  %v41_v34 = vmul.f32 0.03125, %v39_v33 }
 0x12c   :  { %v43_v35 = vadd.f32 1e-05, %v41_v34 }
 0x12e   :  { %1217 = vrsqrt.f32 %v43_v35 }
 0x134   :  { %v1216_v40 = vpop.eup %1215 }
 0x135   :  { %v46_v42 = vmul.f32 %v1216_v40, %v30_v6 }
 0x137   :  { %978 = vmatmul.mubr.msk.f32.vlgmr.msra.gmra.mrb[0].mxu0 %vm20_vm0, %v46_v42 }
 0x138   :  { %v1218_v46 = vpop.eup %1217  ;;  %1149 = vmatpush1.bf16.msra.mxu0 %v1148_v41  ;;  %140 = vmatprep.mubr.f32.mxu0 %v1283_v25 }
 0x139   :  { %v47_v48 = vmul.f32 %v1218_v46, %v31_v10  ;;  %1151 = vmatprep.subr.bf16.mxu0 %v1150_v43 }
 0x13b   :  { %979 = vmatmul.mubr.msk.f32.gmra.mrb[2].mxu0 %vm20_vm0, %v47_v48 }
 0x13c   :  { %1153 = vmatpush1.bf16.msra.mxu0 %v1152_v47  ;;  %211 = vmatprep.mubr.f32.mxu0 %v1283_v25 }
 0x13f   :  { %980 = vmatmul.mubr.msk.f32.vlgmr.msra.gmra.mrb[4].mxu0 %vm20_vm0, %v46_v42 }
 0x140   :  { %217 = vmatprep.mubr.f32.mxu0 %v1283_v25 }
 0x143   :  { %981 = vmatmul.mubr.msk.f32.gmra.mrb[6].mxu0 %vm20_vm0, %v47_v48 }
 0x20a   :  { %v136_v49 = vpop.f32.mrb[0].mxu0 }
 0x20b   :  { %v138_v50 = vpop.f32.mrb[1].mxu0 }
 0x20c   :  { %v1000_v51 = vmul.f32 -1.442695, %v138_v50 }
 0x20e   :  { %1219 = vpow2.f32 %v1000_v51  ;;  %v142_v52 = vpop.f32.mrb[2].mxu0 }
 0x20f   :  { %v144_v53 = vpop.f32.mrb[3].mxu0 }
 0x210   :  { %v1001_v54 = vmul.f32 -1.442695, %v144_v53 }
 0x212   :  { %1221 = vpow2.f32 %v1001_v54  ;;  %v213_v57 = vpop.f32.mrb[4].mxu0 }
 0x213   :  { %v228_v58 = vmul.f32 %v224_v55, %v213_v57  ;;  %v215_v59 = vpop.f32.mrb[5].mxu0 }
 0x214   :  { %v230_v60 = vmul.f32 %v226_v56, %v215_v59 }
 0x216   :  { %v1393_v63 = vadd.f32 %v230_v60, %v228_v58  ;;  %v219_v0 = vpop.f32.mrb[6].mxu0 }
 0x217   :  { %v229_v1 = vmul.f32 %v225_v61, %v219_v0  ;;  %v221_v2 = vpop.f32.mrb[7].mxu0 }
 0x218   :  { %v1220_v3 = vpop.eup %1219  ;;  %v231_v4 = vmul.f32 %v227_v62, %v221_v2  ;;  %235 = vrot.lane.b32.xlu1 %v1393_v63, %s1284_s30  ;;  %248 = vrot.lane.b32.xlu0 %v1393_v63, %s1285_s5 }
 0x219   :  { %v793_v5 = vadd.f32 1.0, %v1220_v3  ;;  %1054 = vmatprep.mubr.msk.f32.mxu0 %vm250_vm1, %v1393_v63 }
 0x21a   :  { %v1399_v6 = vadd.f32 %v231_v4, %v229_v1 }
 0x21b   :  { %1223 = vrcp.f32 %v793_v5 }
 0x21c   :  { %v1222_v7 = vpop.eup %1221  ;;  %239 = vrot.lane.b32.xlu1 %v1393_v63, %s1286_s2  ;;  %237 = vrot.lane.b32.xlu0 %v1393_v63, %s1287_s6 }
 0x21d   :  { %v794_v8 = vadd.f32 1.0, %v1222_v7  ;;  %1062 = vmatprep.mubr.msk.f32.mxu1 %vm250_vm1, %v1399_v6 }
 0x21f   :  { %1225 = vrcp.f32 %v794_v8 }
 0x220   :  { %244 = vrot.lane.b32.xlu0 %v1399_v6, %s1287_s6  ;;  %346 = vrot.lane.b32.xlu1 %v1399_v6, %s1285_s5 }
 0x224   :  { %242 = vrot.lane.b32.xlu1 %v1399_v6, %s1284_s30 }
 0x225   :  { %v1224_v9 = vpop.eup %1223 }
 0x226   :  { %v799_v10 = vmul.f32 %v1224_v9, %v138_v50 }
 0x228   :  { %v1408_v11 = vmul.f32 %v799_v10, %v136_v49  ;;  %246 = vrot.lane.b32.xlu1 %v1399_v6, %s1286_s2 }
 0x229   :  { %v1226_v12 = vpop.eup %1225 }
 0x22a   :  { %v800_v13 = vmul.f32 %v1226_v12, %v144_v53 }
 0x22c   :  { %v1411_v14 = vmul.f32 %v800_v13, %v142_v52 }
 0x28a   :  { %v236_v15 = vpop.permute.xlu1 %235  ;;  %v249_v16 = vpop.permute.xlu0 %248 }
 0x28b   :  { %1052 = vmatprep.subr.msk.mxu0 %vm250_vm1, %v249_v16 }
 0x28c   :  { %1053 = vmatpush3.xpose.msk.msra.mxu0 %vm250_vm1, %v249_v16 }
 0x28e   :  { %v240_v17 = vpop.permute.xlu1 %239  ;;  %v238_v18 = vpop.permute.xlu0 %237 }
 0x28f   :  { %1055 = vmatmul.mubr.msk.f32.vlgmr.msra.gmra.mrb[8].mxu0 %vm250_vm1, %v236_v15 }
 0x290   :  { %1057 = vmatprep.mubr.msk.f32.mxu0 %vm250_vm1, %v238_v18 }
 0x292   :  { %v347_v19 = vpop.permute.xlu1 %346  ;;  %v245_v21 = vpop.permute.xlu0 %244 }
 0x293   :  { %1058 = vmatmul.mubr.msk.f32.gmra.mrb[10].mxu0 %vm250_vm1, %v240_v17  ;;  %1060 = vmatprep.subr.msk.mxu1 %vm250_vm1, %v347_v19 }
 0x294   :  { %1061 = vmatpush3.xpose.msk.msra.mxu1 %vm250_vm1, %v347_v19 }
 0x296   :  { %v243_v20 = vpop.permute.xlu1 %242 }
 0x297   :  { %1063 = vmatmul.mubr.msk.f32.vlgmr.msra.gmra.mrb[0].mxu1 %vm250_vm1, %v243_v20 }
 0x298   :  { %1065 = vmatprep.mubr.msk.f32.mxu1 %vm250_vm1, %v245_v21 }
 0x29a   :  { %v247_v22 = vpop.permute.xlu1 %246 }
 0x29b   :  { %1066 = vmatmul.mubr.msk.f32.gmra.mrb[2].mxu1 %vm250_vm1, %v247_v22 }
 0x362   :  { %v1056_v23 = vpop.f32.mrb[8].mxu0 }
 0x363   :  { %v327_v24 = vpop.f32.mrb[9].mxu0  ;;  %v447_v25 = vsel %vm443_vm2, %v1056_v23, -inf }
 0x364   :  { %448 = vmax.xlane.f32.xlu1 %v447_v25  ;;  %v444_v26 = vsel %vm443_vm2, %v327_v24, -inf }
 0x365   :  { %445 = vmax.xlane.f32.xlu0 %v444_v26 }
 0x366   :  { %v1059_v27 = vpop.f32.mrb[10].mxu0 }
 0x367   :  { %v337_v28 = vpop.f32.mrb[11].mxu0  ;;  %v453_v29 = vsel %vm443_vm2, %v1059_v27, -inf }
 0x368   :  { %454 = vmax.xlane.f32.xlu1 %v453_v29  ;;  %v450_v37 = vsel %vm443_vm2, %v337_v28, -inf }
 0x36a   :  { %v1064_v30 = vpop.f32.mrb[0].mxu1 }
 0x36b   :  { %v424_v31 = vpop.f32.mrb[1].mxu1  ;;  %v459_v32 = vsel %vm443_vm2, %v1064_v30, -inf }
 0x36c   :  { %460 = vmax.xlane.f32.xlu0 %v459_v32  ;;  %v456_v35 = vsel %vm443_vm2, %v424_v31, -inf }
 0x36e   :  { %v1067_v33 = vpop.f32.mrb[2].mxu1 }
 0x36f   :  { %v434_v34 = vpop.f32.mrb[3].mxu1  ;;  %v465_v36 = vsel %vm443_vm2, %v1067_v33, -inf }
 0x370   :  { %457 = vmax.xlane.f32.xlu0 %v456_v35  ;;  %466 = vmax.xlane.f32.xlu1 %v465_v36  ;;  %v462_v38 = vsel %vm443_vm2, %v434_v34, -inf }
 0x374   :  { %451 = vmax.xlane.f32.xlu0 %v450_v37 }
 0x378   :  { %463 = vmax.xlane.f32.xlu0 %v462_v38 }
 0x3f1   :  { %v449_v39 = vpop.xlane.xlu1 %448 }
 0x3f2   :  { %v469_v40 = vsub.f32 %v1056_v23, %v449_v39  ;;  %v446_v41 = vpop.xlane.xlu0 %445 }
 0x3f3   :  { %v468_v42 = vsub.f32 %v327_v24, %v446_v41 }
 0x3f4   :  { %v478_v43 = vmul.f32 1.442695, %v469_v40 }
 0x3f5   :  { %v476_v44 = vmul.f32 1.442695, %v468_v42  ;;  %v455_v45 = vpop.xlane.xlu1 %454  ;;  %v767_v42 = vld [vmem:[%s1560_s3 + $0x20] sm:$0xff] }
 0x3f6   :  { %1227 = vpow2.f32 %v478_v43  ;;  %v471_v46 = vsub.f32 %v1059_v27, %v455_v45  ;;  %v768_v43 = vld [vmem:[%s1560_s3 + $0x28] sm:$0xff] }
 0x3f7   :  { %1229 = vpow2.f32 %v476_v44 }
 0x3f8   :  { %v482_v49 = vmul.f32 1.442695, %v471_v46 }
 0x3f9   :  { %v461_v47 = vpop.xlane.xlu0 %460 }
 0x3fa   :  { %v473_v48 = vsub.f32 %v1064_v30, %v461_v47 }
 0x3fc   :  { %v486_v50 = vmul.f32 1.442695, %v473_v48  ;;  %v1162_v48 = vpack.c.bf16 %v768_v43, %v767_v42 }
 0x3fd   :  { %v458_v51 = vpop.xlane.xlu0 %457  ;;  %v467_v52 = vpop.xlane.xlu1 %466 }
 0x3fe   :  { %1231 = vpow2.f32 %v486_v50  ;;  %v472_v53 = vsub.f32 %v424_v31, %v458_v51  ;;  %v475_v54 = vsub.f32 %v1067_v33, %v467_v52  ;;  %v765_v33 = vld [vmem:[%s1560_s3 + $0x10] sm:$0xff]  ;;  %v770_v51 = vld [vmem:[%s1560_s3 + $0x38] sm:$0xff] }
 0x3ff   :  { %1233 = vpow2.f32 %v482_v49  ;;  %v769_v50 = vld [vmem:[%s1560_s3 + $0x30] sm:$0xff] }
 0x400   :  { %v1431_v55 = vpop.eup %1227  ;;  %v484_v56 = vmul.f32 1.442695, %v472_v53  ;;  %v490_v57 = vmul.f32 1.442695, %v475_v54  ;;  %v1166_v54 = vpack.c.bf16 %v770_v51, %v769_v50 }
 0x401   :  { %v1230_v58 = vpop.eup %1229  ;;  %v452_v59 = vpop.xlane.xlu0 %451  ;;  %v495_v60 = vsel %vm443_vm2, %v1431_v55, 0.0 }
 0x402   :  { %1235 = vpow2.f32 %v484_v56  ;;  %v470_v61 = vsub.f32 %v337_v28, %v452_v59  ;;  %496 = vadd.xlane.f32.xlu1 %v495_v60  ;;  %v492_v62 = vsel %vm443_vm2, %v1230_v58, 0.0  ;;  %v772_v56 = vld [vmem:[%s1560_s3 + $0x48] sm:$0xff]  ;;  %v774_v59 = vld [vmem:[%s1560_s3 + $0x58] sm:$0xff] }
 0x403   :  { %493 = vadd.xlane.f32.xlu0 %v492_v62  ;;  %1237 = vpow2.f32 %v490_v57 }
 0x404   :  { %v480_v0 = vmul.f32 1.442695, %v470_v61  ;;  %v775_v61 = vld [vmem:[%s1560_s3 + $0x60] sm:$0xff] }
 0x405   :  { %v464_v1 = vpop.xlane.xlu0 %463 }
 0x406   :  { %1239 = vpow2.f32 %v480_v0  ;;  %v474_v2 = vsub.f32 %v434_v34, %v464_v1  ;;  %v766_v34 = vld [vmem:[%s1560_s3 + $0x18] sm:$0xff]  ;;  %v777_v0 = vld [vmem:[%s1560_s3 + $0x70] sm:$0xff] }
 0x407   :  { %v1158_v40 = vpack.c.bf16 %v766_v34, %v765_v33  ;;  %v778_v1 = vld [vmem:[%s1560_s3 + $0x78] sm:$0xff] }
 0x408   :  { %v1232_v3 = vpop.eup %1231  ;;  %v488_v4 = vmul.f32 1.442695, %v474_v2  ;;  %v1182_v2 = vpack.c.bf16 %v778_v1, %v777_v0 }
 0x409   :  { %v507_v5 = vsel %vm443_vm2, %v1232_v3, 0.0  ;;  %v1437_v7 = vpop.eup %1233 }
 0x40a   :  { %1241 = vpow2.f32 %v488_v4  ;;  %508 = vadd.xlane.f32.xlu1 %v507_v5  ;;  %v501_v9 = vsel %vm443_vm2, %v1437_v7, 0.0  ;;  %v780_v4 = vld [vmem:[%s1560_s3 + $0x88] sm:$0xff] }
 0x40c   :  { %v1236_v8 = vpop.eup %1235 }
 0x40d   :  { %v504_v10 = vsel %vm443_vm2, %v1236_v8, 0.0  ;;  %v1442_v12 = vpop.eup %1237 }
 0x40e   :  { %502 = vadd.xlane.f32.xlu1 %v501_v9  ;;  %505 = vadd.xlane.f32.xlu0 %v504_v10  ;;  %v513_v15 = vsel %vm443_vm2, %v1442_v12, 0.0  ;;  %v783_v9 = vld [vmem:[%s1560_s3 + $0xa0] sm:$0xff]  ;;  %v784_v10 = vld [vmem:[%s1560_s3 + $0xa8] sm:$0xff] }
 0x410   :  { %v1240_v13 = vpop.eup %1239 }
 0x411   :  { %v498_v16 = vsel %vm443_vm2, %v1240_v13, 0.0 }
 0x412   :  { %514 = vadd.xlane.f32.xlu1 %v513_v15  ;;  %499 = vadd.xlane.f32.xlu0 %v498_v16  ;;  %v786_v15 = vld [vmem:[%s1560_s3 + $0xb8] sm:$0xff] }
 0x414   :  { %v1242_v17 = vpop.eup %1241 }
 0x415   :  { %v510_v18 = vsel %vm443_vm2, %v1242_v17, 0.0 }
 0x416   :  { %511 = vadd.xlane.f32.xlu0 %v510_v18 }
 0x423   :  { %648 = vrot.lane.b32.xlu1 %v1399_v6, %s1288_s7  ;;  %v763_v6 = vld [vmem:[%s1560_s3] sm:$0xff] }
 0x42c   :  { %532 = vrot.lane.b32.xlu0 %v1393_v63, %s1288_s7  ;;  %v764_v63 = vld [vmem:[%s1560_s3 + $0x8] sm:$0xff] }
 0x42d   :  { %v1154_v28 = vpack.c.bf16 %v764_v63, %v763_v6 }
 0x48f   :  { %v497_v20 = vpop.xlane.xlu1 %496 }
 0x490   :  { %v494_v19 = vpop.xlane.xlu0 %493 }
 0x491   :  { %1243 = vrcp.f32 %v494_v19 }
 0x492   :  { %1245 = vrcp.f32 %v497_v20 }
 0x497   :  { %v509_v21 = vpop.xlane.xlu1 %508 }
 0x498   :  { %1247 = vrcp.f32 %v509_v21 }
 0x49b   :  { %v1244_v22 = vpop.eup %1243  ;;  %v503_v23 = vpop.xlane.xlu1 %502 }
 0x49c   :  { %v506_v24 = vpop.xlane.xlu0 %505  ;;  %v524_v25 = vmul.f32 %v1244_v22, %v1230_v58  ;;  %v1246_v31 = vpop.eup %1245  ;;  %v773_v58 = vld [vmem:[%s1560_s3 + $0x50] sm:$0xff] }
 0x49d   :  { %1249 = vrcp.f32 %v506_v24  ;;  %v525_v37 = vmul.f32 %v1246_v31, %v1431_v55  ;;  %v771_v55 = vld [vmem:[%s1560_s3 + $0x40] sm:$0xff]  ;;  %v1174_v60 = vpack.c.bf16 %v774_v59, %v773_v58 }
 0x49e   :  { %1070 = vmatprep.mubr.msk.f32.mxu0 %vm443_vm2, %v524_v25  ;;  %1251 = vrcp.f32 %v503_v23  ;;  %v1170_v57 = vpack.c.bf16 %v772_v56, %v771_v55 }
 0x49f   :  { %v515_v26 = vpop.xlane.xlu1 %514 }
 0x4a0   :  { %v500_v27 = vpop.xlane.xlu0 %499 }
 0x4a1   :  { %1253 = vrcp.f32 %v500_v27 }
 0x4a2   :  { %1255 = vrcp.f32 %v515_v26  ;;  %v1248_v32 = vpop.eup %1247 }
 0x4a3   :  { %v649_v29 = vpop.permute.xlu1 %648  ;;  %v529_v39 = vmul.f32 %v1248_v32, %v1232_v3  ;;  %v779_v3 = vld [vmem:[%s1560_s3 + $0x80] sm:$0xff] }
 0x4a4   :  { %v512_v30 = vpop.xlane.xlu0 %511  ;;  %1076 = vmatprep.subr.mxu1 %v649_v29  ;;  %v1186_v5 = vpack.c.bf16 %v780_v4, %v779_v3 }
 0x4a5   :  { %1257 = vrcp.f32 %v512_v30  ;;  %1077 = vmatpush3.msra.mxu1 %v649_v29 }
 0x4a6   :  { %1155 = vmatprep.subr.bf16.mxu1 %v1154_v28 }
 0x4a7   :  { %v1250_v35 = vpop.eup %1249 }
 0x4a8   :  { %v533_v36 = vpop.permute.xlu0 %532  ;;  %v528_v38 = vmul.f32 %v1250_v35, %v1236_v8  ;;  %v1252_v41 = vpop.eup %1251  ;;  %v782_v8 = vld [vmem:[%s1560_s3 + $0x98] sm:$0xff] }
 0x4a9   :  { %1068 = vmatprep.subr.mxu0 %v533_v36  ;;  %v527_v47 = vmul.f32 %v1252_v41, %v1437_v7  ;;  %v781_v7 = vld [vmem:[%s1560_s3 + $0x90] sm:$0xff] }
 0x4aa   :  { %1069 = vmatpush3.msra.mxu0 %v533_v36  ;;  %1078 = vmatprep.mubr.msk.f32.mxu1 %vm443_vm2, %v528_v38 }
 0x4ab   :  { %1071 = vmatmul.mubr.msk.f32.vlgmr.msra.gmra.mrb[12].mxu0 %vm443_vm2, %v525_v37  ;;  %v1254_v44 = vpop.eup %1253  ;;  %1079 = vmatmul.mubr.msk.f32.vlgmr.msra.gmra.mrb[4].mxu1 %vm443_vm2, %v529_v39 }
 0x4ac   :  { %1157 = vmatpush3.bf16.msra.mxu1 %v1154_v28  ;;  %v526_v45 = vmul.f32 %v1254_v44, %v1240_v13  ;;  %v1256_v46 = vpop.eup %1255  ;;  %1187 = vmatprep.subr.bf16.mxu0 %v1186_v5  ;;  %v785_v13 = vld [vmem:[%s1560_s3 + $0xb0] sm:$0xff] }
 0x4ad   :  { %1159 = vmatprep.subr.bf16.mxu1 %v1158_v40  ;;  %v531_v53 = vmul.f32 %v1256_v46, %v1442_v12  ;;  %1189 = vmatpush3.bf16.msra.mxu0 %v1186_v5  ;;  %v1194_v12 = vpack.c.bf16 %v784_v10, %v783_v9  ;;  %v1198_v16 = vpack.c.bf16 %v786_v15, %v785_v13 }
 0x4ae   :  { %1073 = vmatprep.mubr.msk.f32.mxu0 %vm443_vm2, %v526_v45 }
 0x4af   :  { %v1258_v49 = vpop.eup %1257  ;;  %1074 = vmatmul.mubr.msk.f32.gmra.mrb[14].mxu0 %vm443_vm2, %v527_v47 }
 0x4b0   :  { %v530_v52 = vmul.f32 %v1258_v49, %v1242_v17  ;;  %1161 = vmatpush3.bf16.msra.mxu1 %v1158_v40 }
 0x4b1   :  { %1163 = vmatprep.subr.bf16.mxu1 %v1162_v48 }
 0x4b2   :  { %1081 = vmatprep.mubr.msk.f32.mxu1 %vm443_vm2, %v530_v52 }
 0x4b3   :  { %1082 = vmatmul.mubr.msk.f32.gmra.mrb[6].mxu1 %vm443_vm2, %v531_v53 }
 0x4b4   :  { %1116 = vmatprep.mubr.f32.mxu1 %v1408_v11  ;;  %1165 = vmatpush3.bf16.msra.mxu1 %v1162_v48  ;;  %v776_v11 = vld [vmem:[%s1560_s3 + $0x68] sm:$0xff]  ;;  %s1291_s3 = smov [#allocation2]  }
 0x4b5   :  { %1167 = vmatprep.subr.bf16.mxu1 %v1166_v54  ;;  %v1178_v62 = vpack.c.bf16 %v776_v11, %v775_v61 }
 0x4b8   :  { %1169 = vmatpush3.bf16.msra.mxu1 %v1166_v54 }
 0x4b9   :  { %1171 = vmatprep.subr.bf16.mxu1 %v1170_v57 }
 0x4bc   :  { %1173 = vmatpush3.bf16.msra.mxu1 %v1170_v57 }
 0x4bd   :  { %1175 = vmatprep.subr.bf16.mxu1 %v1174_v60 }
 0x4c0   :  { %1177 = vmatpush3.bf16.msra.mxu1 %v1174_v60 }
 0x4c1   :  { %1179 = vmatprep.subr.bf16.mxu1 %v1178_v62 }
 0x4c4   :  { %1181 = vmatpush3.bf16.msra.mxu1 %v1178_v62 }
 0x4c5   :  { %1183 = vmatprep.subr.bf16.mxu1 %v1182_v2 }
 0x4c8   :  { %1185 = vmatpush3.bf16.msra.mxu1 %v1182_v2 }
 0x4cb   :  { %1117 = vmatmul.mubr.f32.vlgmr.msra.gmra.mrb[8].mxu1 %v1411_v14  ;;  %v1190_v14 = vpack.c.bf16 %v782_v8, %v781_v7 }
 0x4cd   :  { %1191 = vmatprep.subr.bf16.mxu0 %v1190_v14 }
 0x4ce   :  { %1193 = vmatpush3.bf16.msra.mxu0 %v1190_v14 }
 0x4cf   :  { %1195 = vmatprep.subr.bf16.mxu0 %v1194_v12 }
 0x4d2   :  { %1197 = vmatpush3.bf16.msra.mxu0 %v1194_v12 }
 0x4d3   :  { %1199 = vmatprep.subr.bf16.mxu0 %v1198_v16 }
 0x4d6   :  { %1201 = vmatpush3.bf16.msra.mxu0 %v1198_v16 }
 0x57e   :  { %v1072_v17 = vpop.f32.mrb[12].mxu0  ;;  %v1080_v18 = vpop.f32.mrb[4].mxu1 }
 0x57f   :  { %633 = vrot.lane.b32.xlu1 %v1072_v17, %s1289_s26  ;;  %v613_v19 = vpop.f32.mrb[13].mxu0  ;;  %749 = vrot.lane.b32.xlu0 %v1080_v18, %s1289_s26  ;;  %v729_v20 = vpop.f32.mrb[5].mxu1 }
 0x582   :  { %v1075_v21 = vpop.f32.mrb[14].mxu0 }
 0x583   :  { %641 = vrot.lane.b32.xlu1 %v1075_v21, %s1288_s7  ;;  %v623_v22 = vpop.f32.mrb[15].mxu0 }
 0x586   :  { %v1083_v23 = vpop.f32.mrb[6].mxu1 }
 0x587   :  { %v739_v24 = vpop.f32.mrb[7].mxu1  ;;  %637 = vrot.lane.b32.xlu1 %v623_v22, %s1290_s27 }
 0x588   :  { %753 = vrot.lane.b32.xlu0 %v739_v24, %s1290_s27 }
 0x58b   :  { %757 = vrot.lane.b32.xlu1 %v1083_v23, %s1288_s7  ;;  %s967_s7 = sshll.u32 %s1291_s3, 4  ;;  %s968_s7 = int_to_ptr.vmem [resolvable:$true] %s967_s7 }
 0x58c   :  { %s1259_s28 = scalar_lea.vmem %s968_s7, 256  ;;  %p1264_p1 = scmp.lt.s32.totalorder %s968_s7, %s968_s7 }
 0x58d   :  { %p1260_p0 = scmp.ne.s32.totalorder %s968_s7, %s1259_s28  ;;  %p1265_p2 = scmp.lt.s32.totalorder %s1259_s28, %s1259_s28 }
 0x58f   :  { %p1266_p3 = por %p1265_p2, %p1264_p1 }
 0x591   :  { %p1267_p4 = pnand %p1266_p3, %p1260_p0 }
 0x59e   :  { %v1118_v25 = vpop.f32.mrb[8].mxu1 }
 0x59f   :  { %v869_v26 = vpop.f32.mrb[9].mxu1 }
 0x5f1   :  { %v634_v27 = vpop.permute.xlu1 %633  ;;  %v750_v63 = vpop.permute.xlu0 %749 }
 0x5f2   :  { %v644_v28 = vsel %vm250_vm1, %v613_v19, %v634_v27  ;;  %v760_v33 = vsel %vm250_vm1, %v729_v20, %v750_v63 }
 0x5f5   :  { %v642_v6 = vpop.permute.xlu1 %641 }
 0x5f9   :  { %v638_v29 = vpop.permute.xlu1 %637 }
 0x5fa   :  { %v645_v30 = vsel %vm20_vm0, %v644_v28, %v638_v29  ;;  %v754_v31 = vpop.permute.xlu0 %753 }
 0x5fb   :  { %v647_v32 = vsel %vm646_vm3, %v645_v30, %v642_v6  ;;  %v761_v34 = vsel %vm20_vm0, %v760_v33, %v754_v31 }
 0x5fc   :  { %1135 = vmatprep.mubr.msk.f32.mxu0 %vm878_vm4, %v647_v32 }
 0x5fd   :  { %v758_v35 = vpop.permute.xlu1 %757 }
 0x5fe   :  { %v762_v36 = vsel %vm646_vm3, %v761_v34, %v758_v35 }
 0x5ff   :  { %1136 = vmatmul.mubr.msk.f32.vlgmr.msra.gmra.mrb[16].mxu0 %vm878_vm4, %v762_v36 }
 0x6d2   :  { %v1137_v37 = vpop.f32.mrb[16].mxu0 }
 0x6d3   :  { %v957_v38 = vadd.f32 %v1137_v37, %v1118_v25  ;;  %v951_v39 = vpop.f32.mrb[17].mxu0 }
 0x6d4   :  { %v952_v40 = vadd.f32 %v951_v39, %v869_v26 }
 0x6d5   :  { %961 = vst.msk [vmem:[#allocation2 + $0x8] sm:$0xff] %vm20_vm0, %v957_v38 }
 0x6d6   :  { %960 = vst.msk [vmem:[#allocation2] sm:$0xff] %vm20_vm0, %v952_v40 }
 0x6d7   :  { %1270 = shalt.err (!%p1267_p4)
}
 0x6d8   :  { %s1271_s5 = scalar_lea.hbm %s1561_s4, 256 }
 0x6d9   :  { %p1272_p5 = scmp.ne.s32.totalorder %s1561_s4, %s1271_s5  ;;  %p1275_p6 = scmp.lt.u32.totalorder %s1271_s5, %s1561_s4 }
 0x6db   :  { %p1277_p7 = pnand %p1275_p6, %p1272_p5 }
 0x6dd   :  { %1280 = shalt.err (!%p1277_p7)
}
 0x6de   :  { %s1292_s10 = smov 128   ;;  %s1293_s11 = smov 8  }
 0x6df   :  { %973 = dma.vmem_to_hbm [thread:$0]  %s968_s7, 256, %s1561_s4, [#allocation3], %s1292_s10, %s1292_s10, %s1293_s11  }
 0x6e0   :  { %1281 = dma.done.wait [#allocation3], 256  }
 0x6e1   :  { %1282 = vsyncadd [#allocation3], 4294967040 }
 0x6e2   :  { %977 = vsyncpa [#allocation3], 1 }

</bundles_post_ra>
